<compile_context>
chip_gen: v5e
topology: v5e:2x2
jax: 0.10.0
libtpu: 0.0.40
codegen_flags: <defaults>
</compile_context>

<pallas_src>
import functools
import math

import jax
import jax.numpy as jnp
from jax.experimental import pallas as pl
from jax.experimental.pallas import tpu as pltpu


def _round_up(x, m):
    return (x + m - 1) // m * m


def _vmem_capacity_bytes():
    """Physical VMEM per core; conservative fallback if the query fails."""
    try:
        return int(pltpu.get_tpu_info().vmem_capacity_bytes)
    except Exception:
        return 64 * 1024 * 1024  # v7x per-TC size; safe lower bound


def _pad_and_tile(n, tm, tk):
    """Pick padded node count + (row, K) tiles.

    Guarantees tm % 32 == 0 (int8 sublane packing), tk % 128 == 0,
    tk % tm == 0 and n_pad % tk == 0 (so n_pad % tm == 0 too).
    """
    tm = _round_up(max(32, min(tm, _round_up(n, 32))), 32)
    lcm = tm * 128 // math.gcd(tm, 128)
    tk = _round_up(max(lcm, min(tk, _round_up(n, lcm))), lcm)
    n_pad = _round_up(n, tk)
    return n_pad, tm, tk


def _pad2d(a, rows, cols):
    return jnp.pad(a, ((0, rows - a.shape[0]), (0, cols - a.shape[1])))


# ---------------------------------------------------------------------------
# Kernel 1: per-layer neighbor-feature precompute  H = x @ W_l  (bf16 out)
# ---------------------------------------------------------------------------
def _precompute_kernel(x_ref, wl_ref, h_ref):
    x = x_ref[...].astype(wl_ref.dtype)  # bf16 MXU path (no-op after layer 0)
    h = jnp.dot(x, wl_ref[...], preferred_element_type=jnp.float32)
    h_ref[...] = h.astype(h_ref.dtype)


def precompute_linear(x, w_l, *, tm, compute_dtype, vmem_limit):
    n_pad, c_in_pad = x.shape
    c_out_pad = w_l.shape[1]
    grid = (n_pad // tm,)
    flops = 2 * n_pad * c_in_pad * c_out_pad
    bytes_accessed = (
        n_pad * c_in_pad * x.dtype.itemsize
        + c_in_pad * c_out_pad * w_l.dtype.itemsize
        + n_pad * c_out_pad * jnp.dtype(compute_dtype).itemsize
    )
    return pl.pallas_call(
        _precompute_kernel,
        out_shape=jax.ShapeDtypeStruct((n_pad, c_out_pad), compute_dtype),
        grid_spec=pltpu.PrefetchScalarGridSpec(
            num_scalar_prefetch=0,
            grid=grid,
            in_specs=[
                pl.BlockSpec((tm, c_in_pad), lambda i: (i, 0)),
                pl.BlockSpec((c_in_pad, c_out_pad), lambda i: (0, 0)),
            ],
            out_specs=pl.BlockSpec((tm, c_out_pad), lambda i: (i, 0)),
        ),
        compiler_params=pltpu.CompilerParams(
            dimension_semantics=("parallel",),
            vmem_limit_bytes=vmem_limit,
        ),
        cost_estimate=pl.CostEstimate(
            flops=int(flops), transcendentals=0, bytes_accessed=int(bytes_accessed)
        ),
    )(x, w_l)


# ---------------------------------------------------------------------------
# Kernel 2: tiled mean-aggregation + fused root term
#   out = (A_counts @ H) * inv_deg + x @ W_r + b   (+ optional ReLU)
# ---------------------------------------------------------------------------
def _sage_aggregate_kernel(a_ref, h_ref, x_ref, wr_ref, b_ref, invdeg_ref,
                           o_ref, acc_ref, *, apply_relu, tk, h_resident):
    k = pl.program_id(1)

    @pl.when(k == 0)
    def _():
        acc_ref[...] = jnp.zeros_like(acc_ref)

    # int8 edge counts -> bf16 on the VPU (exact for small integers).
    a = a_ref[...].astype(jnp.bfloat16)
    if h_resident:
        off = pl.multiple_of(k * tk, tk)
        h = h_ref[pl.ds(off, tk), :]
    else:
        h = h_ref[...]
    acc_ref[...] += jnp.dot(a, h, preferred_element_type=jnp.float32)

    @pl.when(k == pl.num_programs(1) - 1)
    def _():
        # Fused root term: x_i @ W_r + b (W_r/b are VMEM-resident, MXU has slack).
        root = jnp.dot(x_ref[...].astype(wr_ref.dtype), wr_ref[...],
                       preferred_element_type=jnp.float32)
        out = acc_ref[...] * invdeg_ref[...] + root + b_ref[...]
        if apply_relu:
            out = jnp.maximum(out, 0.0)
        # NOTE: padded rows get relu(b) here; they are only ever multiplied by
        # zero adjacency columns downstream and are sliced off at the end.
        o_ref[...] = out.astype(o_ref.dtype)


def sage_aggregate(counts, h, x, w_r, b2d, inv_deg, *, tm, tk, apply_relu,
                   out_dtype, h_resident, vmem_limit):
    n_pad = counts.shape[0]
    c_in_pad = x.shape[1]
    c_out_pad = h.shape[1]
    grid = (n_pad // tm, n_pad // tk)

    if h_resident:
        # H DMA'd once and kept resident; sliced per K step inside the kernel.
        h_spec = pl.BlockSpec((n_pad, c_out_pad), lambda i, k: (0, 0))
        h_bytes = n_pad * c_out_pad * h.dtype.itemsize
    else:
        h_spec = pl.BlockSpec((tk, c_out_pad), lambda i, k: (k, 0))
        h_bytes = (n_pad // tm) * n_pad * c_out_pad * h.dtype.itemsize

    flops = 2 * n_pad * n_pad * c_out_pad + 2 * n_pad * c_in_pad * c_out_pad
    bytes_accessed = (
        n_pad * n_pad * counts.dtype.itemsize       # int8 adjacency counts
        + h_bytes                                   # actual H traffic
        + n_pad * c_in_pad * x.dtype.itemsize
        + c_in_pad * c_out_pad * w_r.dtype.itemsize
        + n_pad * 4                                 # inv_deg
        + n_pad * c_out_pad * jnp.dtype(out_dtype).itemsize
    )

    kernel = functools.partial(
        _sage_aggregate_kernel, apply_relu=apply_relu, tk=tk,
        h_resident=h_resident)

    return pl.pallas_call(
        kernel,
        out_shape=jax.ShapeDtypeStruct((n_pad, c_out_pad), out_dtype),
        grid_spec=pltpu.PrefetchScalarGridSpec(
            num_scalar_prefetch=0,
            grid=grid,
            in_specs=[
                pl.BlockSpec((tm, tk), lambda i, k: (i, k)),            # A counts
                h_spec,                                                 # H
                pl.BlockSpec((tm, c_in_pad), lambda i, k: (i, 0)),      # x rows
                pl.BlockSpec((c_in_pad, c_out_pad), lambda i, k: (0, 0)),  # W_r
                pl.BlockSpec((1, c_out_pad), lambda i, k: (0, 0)),      # b
                pl.BlockSpec((tm, 1), lambda i, k: (i, 0)),             # 1/deg
            ],
            out_specs=pl.BlockSpec((tm, c_out_pad), lambda i, k: (i, 0)),
            # f32 scratch kept (bf16 output would lose accumulation precision).
            scratch_shapes=[pltpu.VMEM((tm, c_out_pad), jnp.float32)],
        ),
        compiler_params=pltpu.CompilerParams(
            dimension_semantics=("parallel", "arbitrary"),
            vmem_limit_bytes=vmem_limit,
        ),
        cost_estimate=pl.CostEstimate(
            flops=int(flops), transcendentals=0, bytes_accessed=int(bytes_accessed)
        ),
    )(counts, h, x, w_r, b2d, inv_deg)


# ---------------------------------------------------------------------------
# Graph / parameter glue (plain JAX)
# ---------------------------------------------------------------------------
def build_adjacency_counts(edge_index, num_nodes, padded_nodes=None):
    """int8 edge-count matrix (counts[i, j] = #edges j->i) + f32 1/in-degree.

    Duplicate edges are counted in both numerator and degree (PyG 'mean'
    semantics).  Padded rows/cols are zero; their inv_deg is 1 (harmless).
    Degrees via segment_sum (no dense f32 N^2 intermediate + row-sum pass).
    """
    padded_nodes = padded_nodes or num_nodes
    src, dst = edge_index[0], edge_index[1]
    # Scatter-add in int32 for lowering robustness, then narrow to int8.
    counts = jnp.zeros((padded_nodes, padded_nodes), jnp.int32)
    counts = counts.at[dst, src].add(1).astype(jnp.int8)
    deg = jax.ops.segment_sum(
        jnp.ones(src.shape[0], jnp.float32), dst, num_segments=padded_nodes)
    inv_deg = (1.0 / jnp.maximum(deg, 1.0)).reshape(padded_nodes, 1)
    return counts, inv_deg


def init_graphsage_params(key, in_channels, hidden_layers, out_channels):
    """SAGEConv-shaped params: per layer (W_l, W_r, b), W's of (C_in, C_out)."""
    dims = [in_channels, *hidden_layers, out_channels]
    params = []
    for i in range(len(dims) - 1):
        c_in, c_out = dims[i], dims[i + 1]
        key, k1, k2, k3 = jax.random.split(key, 4)
        scale = 1.0 / jnp.sqrt(jnp.float32(c_in))
        w_l = jax.random.uniform(k1, (c_in, c_out), jnp.float32, -scale, scale)
        w_r = jax.random.uniform(k2, (c_in, c_out), jnp.float32, -scale, scale)
        b = jax.random.uniform(k3, (c_out,), jnp.float32, -scale, scale)
        params.append((w_l, w_r, b))
    return params


def graphsage_forward(params, x, edge_index, *, tm=512, tk=1024,
                      compute_dtype=jnp.bfloat16):
    """Inference-mode GraphSAGE forward (dropout == identity)."""
    n, c_in0 = x.shape
    n_pad, tm, tk = _pad_and_tile(n, tm, tk)

    # Generation-aware VMEM budget: ~96 MiB on v5e/v6e (128 MiB physical),
    # ~48 MiB on v7x (64 MiB physical).
    vmem_cap = _vmem_capacity_bytes()
    vmem_limit = min(96 * 1024 * 1024, vmem_cap * 3 // 4)

    # Adjacency as int8 counts + f32 per-row inverse degree (built once).
    counts, inv_deg = build_adjacency_counts(edge_index, n, n_pad)

    # Pad activations: rows to n_pad, channels to a 128-lane multiple.
    x_p = _pad2d(x, n_pad, _round_up(c_in0, 128))

    n_layers = len(params)
    for li, (w_l, w_r, b) in enumerate(params):
        c_in, c_out = w_l.shape
        c_in_pad = _round_up(c_in, 128)
        c_out_pad = _round_up(c_out, 128)
        wl_p = _pad2d(w_l, c_in_pad, c_out_pad).astype(compute_dtype)
        wr_p = _pad2d(w_r, c_in_pad, c_out_pad).astype(compute_dtype)
        b_p = jnp.pad(b, (0, c_out_pad - c_out)).reshape(1, c_out_pad)

        h = precompute_linear(x_p, wl_p, tm=tm, compute_dtype=compute_dtype,
                              vmem_limit=vmem_limit)

        last = li == n_layers - 1
        # Keep H fully VMEM-resident only if its (double-buffered) footprint
        # leaves comfortable headroom for A/x/out tiles on this generation.
        h_dbuf_bytes = 2 * n_pad * c_out_pad * jnp.dtype(compute_dtype).itemsize
        h_resident = h_dbuf_bytes <= vmem_limit // 4

        x_p = sage_aggregate(
            counts, h, x_p, wr_p, b_p, inv_deg,
            tm=tm, tk=tk, apply_relu=not last,
            out_dtype=jnp.float32 if last else compute_dtype,
            h_resident=h_resident, vmem_limit=vmem_limit)

    c_out_last = params[-1][0].shape[1]
    return x_p[:n, :c_out_last].astype(jnp.float32)


# ---------------------------------------------------------------------------
if __name__ == "__main__":
    key = jax.random.PRNGKey(0)
    k_x, k_e, k_p = jax.random.split(key, 3)

    num_nodes = 160
    in_channels = 8
    hidden_layers = [32]
    out_channels = 3
    num_edges = 480

    x = jax.random.normal(k_x, (num_nodes, in_channels), jnp.float32)
    edge_index = jax.random.randint(k_e, (2, num_edges), 0, num_nodes, jnp.int32)
    params = init_graphsage_params(k_p, in_channels, hidden_layers, out_channels)

    # Small tiles so the example exercises both the parallel row axis and the
    # multi-step K-reduction accumulator (n_pad=256 -> grid (4, 2)).
    out = graphsage_forward(params, x, edge_index, tm=64, tk=128)
    jax.block_until_ready(out)

    # Pure-JAX f32 reference (dense row-normalized adjacency).
    def ref_forward(params, x, edge_index):
        src, dst = edge_index[0], edge_index[1]
        a = jnp.zeros((x.shape[0], x.shape[0]), jnp.float32).at[dst, src].add(1.0)
        a = a / jnp.maximum(a.sum(axis=1, keepdims=True), 1.0)
        for w_l, w_r, b in params[:-1]:
            x = jnp.maximum(a @ x @ w_l + x @ w_r + b, 0.0)
        w_l, w_r, b = params[-1]
        return a @ x @ w_l + x @ w_r + b

    ref = ref_forward(params, x, edge_index)
    assert out.shape == (num_nodes, out_channels)
    # Tolerance covers bf16 H / W / intermediate activations (adjacency and
    # 1/deg are now exact: int8 counts + f32 scale).
    max_err = float(jnp.max(jnp.abs(out - ref)))
    assert jnp.allclose(out, ref, atol=5e-2, rtol=5e-2), f"max abs err {max_err}"
    print("KERNEL_OK")
</pallas_src>

<mosaic_0001>
module attributes {stable_mosaic.version = 11 : i64} {
  func.func @_precompute_kernel(%arg0: i32, %arg1: memref<64x128xf32, #tpu.memory_space<vmem>>, %arg2: memref<128x128xbf16, #tpu.memory_space<vmem>>, %arg3: memref<64x128xbf16, #tpu.memory_space<vmem>>) attributes {dimension_semantics = [#tpu.dimension_semantics<parallel>], iteration_bounds = array<i64: 4>, scalar_prefetch = 0 : i64, scratch_operands = 0 : i64, tpu.core_type = #tpu.core_type<tc>, window_params = [{transform_indices = @transform_0, window_bounds = array<i64: 64, 128>}, {pipeline_mode = #tpu.pipeline_mode<synchronous>, transform_indices = @transform_1, window_bounds = array<i64: 128, 128>}, {transform_indices = @transform_2, window_bounds = array<i64: 64, 128>}]} {
    %c0 = arith.constant 0 : index
    %c0_0 = arith.constant 0 : index
    %0 = vector.load %arg1[%c0, %c0_0] : memref<64x128xf32, #tpu.memory_space<vmem>>, vector<64x128xf32>
    %1 = arith.truncf %0 : vector<64x128xf32> to vector<64x128xbf16>
    %c0_1 = arith.constant 0 : index
    %c0_2 = arith.constant 0 : index
    %2 = vector.load %arg2[%c0_1, %c0_2] : memref<128x128xbf16, #tpu.memory_space<vmem>>, vector<128x128xbf16>
    %cst = arith.constant dense<0.000000e+00> : vector<64x128xf32>
    %3 = tpu.matmul %1, %2, %cst {dimension_numbers = #tpu.dot_dimension_numbers<[1], [0], [0], [1], [0, 0, 1, 1], [], []>} : vector<64x128xbf16>, vector<128x128xbf16>, vector<64x128xf32> -> vector<64x128xf32>
    %4 = arith.truncf %3 : vector<64x128xf32> to vector<64x128xbf16>
    %c0_3 = arith.constant 0 : index
    %c0_4 = arith.constant 0 : index
    %5 = vector.load %arg3[%c0_3, %c0_4] : memref<64x128xbf16, #tpu.memory_space<vmem>>, vector<64x128xbf16>
    tpu.vector_store %arg3[%c0_3, %c0_4], %4 {strides = array<i32>} : memref<64x128xbf16, #tpu.memory_space<vmem>>, vector<64x128xbf16>,
    return
  }
  func.func @transform_0(%arg0: i32) -> (i32, i32) {
    %c0_i32 = arith.constant 0 : i32
    %c0_i32_0 = arith.constant 0 : i32
    return %arg0, %c0_i32 : i32, i32
  }
  func.func @transform_1(%arg0: i32) -> (i32, i32) {
    %c0_i32 = arith.constant 0 : i32
    %c0_i32_0 = arith.constant 0 : i32
    %c0_i32_1 = arith.constant 0 : i32
    return %c0_i32, %c0_i32_0 : i32, i32
  }
  func.func @transform_2(%arg0: i32) -> (i32, i32) {
    %c0_i32 = arith.constant 0 : i32
    %c0_i32_0 = arith.constant 0 : i32
    return %arg0, %c0_i32 : i32, i32
  }
}

</mosaic_0001>

<bundles_post_ra>
// kernel: tpu_custom_call.1
= control target key start
LH: loop header
LB: loop body
LE: loop exit
PB: predicated region body
PF: predicated region fallthrough
CT: control target
= control target key end

     0   :  { %7 = vsyncpa [#allocation3], 0  ;;  %s874_s0 = inlined_call_operand.hbm [shape: f32[256,128], index: 0, kind: input, shape index: {}]   ;;  %s875_s1 = inlined_call_operand.hbm [shape: bf16[128,128], index: 1, kind: input, shape index: {}]   ;;  %s876_s2 = inlined_call_operand.hbm [shape: bf16[256,128], index: 2, kind: output, shape index: {}]  }
   0x1   :  { %9 = vsyncpa [#allocation3 + $0x1], 0 }
   0x2   :  { %10 = vsyncpa [#allocation6], 0 }
   0x3   :  { %11 = vsyncpa [#allocation4], 0 }
   0x4   :  { %13 = vsyncpa [#allocation4 + $0x1], 0  ;;  %s725_s9 = smov 0   ;;  %s727_s10 = smov 0  }
   0x5   :  { %s729_s11 = smov 0   ;;  %s731_s12 = smov 0  }
   0x6 LB: > { %s746_s13 = sadd.s32 4294967295, %s701_s12   ;;  %s403_s14 = sadd.s32 4294967294, %s701_s12   ;;  %s701_s12 = sphi %s731_s12, %s885_s12   ;;  %s697_s11 = sphi %s729_s11, %s884_s11   ;;  %s693_s10 = sphi %s727_s10, %s883_s10   ;;  %s689_s9 = sphi %s725_s9, %s882_s9  }
   0x7   : > { %p39_p0 = scmp.ne.s32.totalorder %s693_s10, %s689_s9  ;;  %p40_p1 = scmp.eq.s32.totalorder %s746_s13, 0 }
   0x8   : > { %p84_p2 = scmp.eq.s32.totalorder %s746_s13, 3  ;;  %p90_p3 = scmp.eq.s32.totalorder %s403_s14, 3 }
   0x9   : > { %p755_p4 = por %p40_p1, %p39_p0  ;;  %p404_p5 = scmp.ge.s32.totalorder %s701_s12, 1 }
   0xa   : > { %p760_p6 = por %p90_p3, %p39_p0  ;;  %p97_p7 = scmp.lt.s32.totalorder %s701_s12, 5 }
   0xb   : > { %s108_s19 = sshll.u32 %s875_s1, 4  ;;  %s703_s21 = smov [#allocation5]   ;;  %s109_s19 = int_to_ptr.hbm [resolvable:$true] %s108_s19 }
   0xc   : > { %p768_p8 = pnand %p404_p5, %p97_p7  ;;  %s110_s22 = sshll.u32 %s703_s21, 4  ;;  %s111_s22 = int_to_ptr.vmem [resolvable:$true] %s110_s22 }
   0xd   : > { %s777_s23 = sadd.s32 1, %s701_s12   ;;  %s704_s24 = smov 64  }
   0xe   : > { %p516_p9 = pneg %p768_p8  ;;  %s705_s25 = smov 4  }
   0xf   : > { %s23_s26 = ssub.s32 %s701_s12, %s777_s23  ;;  %s26_s27 = sadd.s32 1, %s697_s11 }
  0x10   : > { %p517_p10 = pnand %p516_p9, %p40_p1  ;;  %p24_p11 = scmp.eq.s32.totalorder %s23_s26, 0 }
  0x11   : > { %p33_p12 = scmp.ne.s32.totalorder %s697_s11, %s693_s10  ;;  %p34_p13 = scmp.eq.s32.totalorder %s701_s12, 0 }
  0x12   : > { %519 = dma.hbm_to_vmem [thread:$0]  (!%p517_p10), %s109_s19, 1024, %s111_s22, [#allocation6], %s704_s24, %s704_s24, %s705_s25  }
  0x13   : > { %p529_p0 = scmp.lt.s32.totalorder %s701_s12, 4  ;;  %p35_p3 = por %p34_p13, %p33_p12 }
  0x14   : > { %s787_s28 = scalar_select %p24_p11, %s697_s11, %s26_s27  }
  0x15   : > { %p791_p5 = por %p84_p2, %p33_p12  ;;  %s124_s30 = sand.u32 1, %s697_s11  }
  0x16   : > { %s451_s3 = sshll.u32 %s701_s12, 6  ;;  %s407_s4 = sshll.u32 %s124_s30, 6 }
  0x17   : > { %s133_s7 = scalar_lea.hbm %s874_s0, %s451_s3  ;;  %s128_s14 = scalar_lea.vmem [#allocation2], %s407_s4 }
  0x18   : > { %s134_s8 = sshll.u32 %s133_s7, 4  ;;  %s136_s17 = sshll.u32 %s128_s14, 4  ;;  %s135_s8 = int_to_ptr.hbm [resolvable:$true] %s134_s8  ;;  %s137_s17 = int_to_ptr.vmem [resolvable:$true] %s136_s17 }
  0x19   : > { %p802_p7 = pnand %p529_p0, %p35_p3  ;;  %s125_s19 = scalar_lea.sflag [#allocation3], %s124_s30 }
  0x1a   : > { %s601_s21 = sshra.s32 %s135_s8, 4  ;;  %s608_s26 = scalar_lea.hbm %s874_s0, 256  ;;  %s602_s21 = int_to_ptr.hbm [resolvable:$true] %s601_s21 }
  0x1b   : > { %s603_s22 = scalar_lea.hbm %s602_s21, 64  ;;  %p605_p9 = pneg %p802_p7 }
  0x1c   : > { %p604_p2 = scmp.ne.s32.totalorder %s602_s21, %s603_s22  ;;  %p609_p12 = scmp.lt.s32.totalorder %s602_s21, %s874_s0 }
  0x1d   : > { %p610_p13 = scmp.lt.s32.totalorder %s608_s26, %s603_s22 }
  0x1e   : > { %p606_p10 = pnand %p605_p9, %p604_p2 }
  0x1f   : > { %p611_p0 = por %p610_p13, %p609_p12 }
  0x20   : > { %p607_p11 = pneg %p606_p10 }
  0x22   : > { %p612_p3 = pnand %p611_p0, %p607_p11 }
  0x24   : > { %615 = shalt.err (!%p612_p3)
}
  0x25   : > { %s706_s30 = smov 128   ;;  %s707_s4 = smov 8  }
  0x26   : > { %523 = dma.hbm_to_vmem [thread:$0]  (!%p802_p7), %s135_s8, 1024, %s137_s17, %s125_s19, %s706_s30, %s706_s30, %s707_s4  }
  0x27   : > { %148 = sbr.rel (%p768_p8) target bundleno = 227 (0xe3), region = 28  ;;  %s819_s5 = sand.u32 (!%p768_p8), 1, %s693_s10  }
  0x28   : > { %s411_s6 = sshll.u32 (!%p768_p8), %s819_s5, 6  ;;  %s151_s7 = scalar_lea.sflag (!%p768_p8), [#allocation3], %s819_s5 }
  0x29   : > { %s823_s14 = scalar_lea.vmem (!%p768_p8), [#allocation2], %s411_s6 }
  0x2c   : > { %676 = dma.done.wait (%p755_p4), %s151_s7, 1024  }
  0x2d   : > { %678 = vsyncadd (%p755_p4), %s151_s7, 4294966272 }
  0x2e   : > { %680 = dma.done.wait (%p40_p1), [#allocation6], 1024  }
  0x2f   : > { %682 = vsyncadd (%p40_p1), [#allocation6], 4294966272  ;;  %v459_v0 = vld [vmem:[#allocation5 + $0x38] sm:$0xff]  ;;  %v458_v1 = vld [vmem:[#allocation5 + $0x30] sm:$0xff]  ;;  %s413_s15 = sshll.u32 %s819_s5, 5  ;;  %s460_s20 = sshll.u32 %s746_s13, 5 }
  0x30   : > { %259 = vmatpush.bf16.msra.mxu0 %v459_v0  ;;  %484 = vmatpush.bf16.msra.mxu1 %v459_v0  ;;  %v457_v2 = vld [vmem:[#allocation5 + $0x28] sm:$0xff]  ;;  %v456_v3 = vld [vmem:[#allocation5 + $0x20] sm:$0xff]  ;;  %v455_v4 = vld [vmem:[#allocation5 + $0x18] sm:$0xff]  ;;  %s316_s18 = scalar_lea.hbm %s876_s2, %s460_s20  ;;  %s180_s19 = scalar_lea.vmem [#allocation7], %s413_s15 }
  0x31   : > { %485 = vmatpush.bf16.msra.mxu2 %v459_v0  ;;  %486 = vmatpush.bf16.msra.mxu3 %v459_v0  ;;  %v454_v5 = vld [vmem:[#allocation5 + $0x10] sm:$0xff]  ;;  %v453_v6 = vld [vmem:[#allocation5 + $0x8] sm:$0xff]  ;;  %v452_v7 = vld [vmem:[#allocation5] sm:$0xff]  ;;  %s317_s21 = sshll.u32 %s180_s19, 4  ;;  %s319_s22 = sshll.u32 %s316_s18, 4  ;;  %s318_s21 = int_to_ptr.vmem [resolvable:$true] %s317_s21  ;;  %s320_s22 = int_to_ptr.hbm [resolvable:$true] %s319_s22 }
  0x32   : > { %v183_v8 = vld [vmem:[%s823_s14] sm:$0xff]  ;;  %v184_v9 = vld [vmem:[%s823_s14 + $0x8] sm:$0xff]  ;;  %v185_v10 = vld [vmem:[%s823_s14 + $0x10] sm:$0xff]  ;;  %s305_s13 = scalar_lea.sflag [#allocation4], %s819_s5  ;;  %s645_s24 = sshra.s32 %s320_s22, 4  ;;  %s646_s24 = int_to_ptr.hbm [resolvable:$true] %s645_s24 }
  0x33   : > { %v186_v11 = vld [vmem:[%s823_s14 + $0x18] sm:$0xff]  ;;  %v187_v12 = vld [vmem:[%s823_s14 + $0x20] sm:$0xff]  ;;  %v188_v13 = vld [vmem:[%s823_s14 + $0x28] sm:$0xff]  ;;  %v191_v16 = vpack.c.bf16 %v184_v9, %v183_v8  ;;  %s647_s25 = scalar_lea.hbm %s646_s24, 32  ;;  %s651_s3 = scalar_lea.hbm %s876_s2, 128 }
  0x34   : > { %260 = vmatpush.bf16.msra.mxu0 %v458_v1  ;;  %487 = vmatpush.bf16.msra.mxu1 %v458_v1  ;;  %v189_v14 = vld [vmem:[%s823_s14 + $0x30] sm:$0xff]  ;;  %v190_v15 = vld [vmem:[%s823_s14 + $0x38] sm:$0xff]  ;;  %v192_v17 = vpack.c.bf16 %v186_v11, %v185_v10  ;;  %v193_v18 = vpack.c.bf16 %v188_v13, %v187_v12  ;;  %p648_p1 = scmp.ne.s32.totalorder %s646_s24, %s647_s25  ;;  %p652_p7 = scmp.lt.s32.totalorder %s646_s24, %s876_s2 }
  0x35   : > { %488 = vmatpush.bf16.msra.mxu2 %v458_v1  ;;  %489 = vmatpush.bf16.msra.mxu3 %v458_v1  ;;  %v194_v19 = vpack.c.bf16 %v190_v15, %v189_v14  ;;  %p653_p2 = scmp.lt.s32.totalorder %s651_s3, %s647_s25 }
  0x36   : > { %p649_p4 = pnand %p648_p1, %p791_p5 }
  0x37   : > { %p654_p9 = por %p653_p2, %p652_p7 }
  0x38   : > { %261 = vmatpush.bf16.msra.mxu0 %v457_v2  ;;  %490 = vmatpush.bf16.msra.mxu1 %v457_v2  ;;  %p650_p8 = pneg %p649_p4 }
  0x39   : > { %491 = vmatpush.bf16.msra.mxu2 %v457_v2  ;;  %492 = vmatpush.bf16.msra.mxu3 %v457_v2 }
  0x3a   : > { %p655_p10 = pnand %p654_p9, %p650_p8 }
  0x3c   : > { %262 = vmatpush.bf16.msra.mxu0 %v456_v3  ;;  %493 = vmatpush.bf16.msra.mxu1 %v456_v3 }
  0x3d   : > { %494 = vmatpush.bf16.msra.mxu2 %v456_v3  ;;  %495 = vmatpush.bf16.msra.mxu3 %v456_v3 }
  0x40   : > { %263 = vmatpush.bf16.msra.mxu0 %v455_v4  ;;  %496 = vmatpush.bf16.msra.mxu1 %v455_v4 }
  0x41   : > { %497 = vmatpush.bf16.msra.mxu2 %v455_v4  ;;  %498 = vmatpush.bf16.msra.mxu3 %v455_v4 }
  0x44   : > { %264 = vmatpush.bf16.msra.mxu0 %v454_v5  ;;  %499 = vmatpush.bf16.msra.mxu1 %v454_v5 }
  0x45   : > { %500 = vmatpush.bf16.msra.mxu2 %v454_v5  ;;  %501 = vmatpush.bf16.msra.mxu3 %v454_v5 }
  0x48   : > { %265 = vmatpush.bf16.msra.mxu0 %v453_v6  ;;  %502 = vmatpush.bf16.msra.mxu1 %v453_v6 }
  0x49   : > { %503 = vmatpush.bf16.msra.mxu2 %v453_v6  ;;  %504 = vmatpush.bf16.msra.mxu3 %v453_v6 }
  0x4c   : > { %266 = vmatpush.bf16.msra.mxu0 %v452_v7  ;;  %505 = vmatpush.bf16.msra.mxu1 %v452_v7 }
  0x4d   : > { %506 = vmatpush.bf16.msra.mxu2 %v452_v7  ;;  %507 = vmatpush.bf16.msra.mxu3 %v452_v7 }
  0x4f   : > { %267 = vmatmul.bf16.vlgmr.msra.gmra.mxu0 %v191_v16  ;;  %272 = vmatmul.bf16.vlgmr.msra.gmra.mxu1 %v192_v17 }
  0x50   : > { %277 = vmatmul.bf16.vlgmr.msra.gmra.mxu2 %v193_v18  ;;  %282 = vmatmul.bf16.vlgmr.msra.gmra.mxu3 %v194_v19 }
  0xcc   : > { %v268_v20 = vpop.f32.mrf.mxu0  ;;  %v273_v21 = vpop.f32.mrf.mxu1 }
  0xd3   : > { %v278_v22 = vpop.f32.mrf.mxu2  ;;  %v283_v23 = vpop.f32.mrf.mxu3 }
  0xd4   : > { %v270_v24 = vpop.f32.mrf.mxu0  ;;  %v275_v25 = vpop.f32.mrf.mxu1 }
  0xd5   : > { %v464_v26 = vpack.c.bf16 %v270_v24, %v268_v20  ;;  %v469_v27 = vpack.c.bf16 %v275_v25, %v273_v21 }
  0xd7   : > { %465 = vst [vmem:[%s180_s19] sm:$0xff] %v464_v26  }
  0xd8   : > { %481 = vst [vmem:[%s180_s19 + $0x8] sm:$0xff] %v469_v27  }
  0xdb   : > { %v280_v28 = vpop.f32.mrf.mxu2  ;;  %v285_v29 = vpop.f32.mrf.mxu3 }
  0xdc   : > { %v474_v30 = vpack.c.bf16 %v280_v28, %v278_v22  ;;  %v479_v31 = vpack.c.bf16 %v285_v29, %v283_v23 }
  0xde   : > { %482 = vst [vmem:[%s180_s19 + $0x10] sm:$0xff] %v474_v30  }
  0xdf   : > { %483 = vst [vmem:[%s180_s19 + $0x18] sm:$0xff] %v479_v31  }
  0xe0   : > { %658 = shalt.err (!%p655_p10)
}
  0xe1   : > { %s708_s5 = smov 64   ;;  %s709_s6 = smov 4  }
  0xe2   : > { %514 = dma.vmem_to_hbm [thread:$0]  (%p791_p5), %s318_s21, 512, %s320_s22, %s305_s13, %s708_s5, %s708_s5, %s709_s6  }
  0xe3 PF: > { %p531_p11 = scmp.ge.s32.totalorder %s701_s12, 2  ;;  %s334_s7 = sand.u32 1, %s689_s9  }
  0xe4   : > { %s335_s14 = scalar_lea.sflag [#allocation4], %s334_s7 }
  0xe5   : > { %p525_p12 = pnand %p531_p11, %p760_p6 }
  0xe7   : > { %p526_p13 = pneg %p525_p12 }
  0xe9   : > { %684 = dma.done.wait (%p526_p13), %s335_s14, 512  }
  0xea   : > { %686 = vsyncadd (%p526_p13), %s335_s14, 4294966784  ;;  %p16_p0 = scmp.ge.s32.totalorder %s777_s23, 6   ;;  %s882_s9 = smov %s693_s10 }
  0xeb   : > { %s883_s10 = smov %s697_s11  ;;  %s884_s11 = smov %s787_s28 }
  0xec   : > { %s885_s12 = smov %s777_s23  ;;  %18 = sbr.rel (!%p16_p0) target bundleno = 6 (0x6), region = 77 }
  0xf1   :  { %341 = vsyncpa [#allocation3], 1 }
  0xf2   :  { %343 = vsyncpa [#allocation3 + $0x1], 1 }
  0xf3   :  { %344 = vsyncpa [#allocation6], 1 }
  0xf4   :  { %345 = vsyncpa [#allocation4], 1 }
  0xf5   :  { %347 = vsyncpa [#allocation4 + $0x1], 1 }

</bundles_post_ra>
